<compile_context>
chip_gen: v6e
topology: v6e:2x2x1
jax: 0.10.0
libtpu: 0.0.40
codegen_flags: <defaults>
</compile_context>

<pallas_src>
import functools

import numpy as np
import jax
import jax.numpy as jnp
from jax import lax
from jax.experimental import pallas as pl
from jax.experimental.pallas import tpu as pltpu


# ------------------------- deterministic weight init -------------------------
# Mirrors sparse_tensor_init / sparse_recurrent_tensor_init / spectral_norm_scaling
# from the PyTorch reference, using a seeded numpy RNG (synthetic, no checkpoint).

def sparse_tensor_init_np(M, N, C, rng):
    W = np.zeros((M, N), dtype=np.float32)
    for i in range(M):
        idx = rng.choice(N, size=C, replace=False)
        vals = 2.0 * (2.0 * rng.random(C).astype(np.float32) - 1.0)
        W[i, idx] = vals
    return W


def sparse_recurrent_tensor_init_np(M, C, rng):
    W = np.zeros((M, M), dtype=np.float32)
    for i in range(M):
        idx = rng.choice(M, size=C, replace=False)
        vals = 2.0 * (2.0 * rng.random(C).astype(np.float32) - 1.0)
        W[idx, i] = vals
    return W


def spectral_norm_scaling_np(W, rho_desired):
    e = np.linalg.eigvals(W)
    rho_curr = np.max(np.abs(e))
    return (W * (rho_desired / rho_curr)).astype(np.float32)


def make_reservoir_params(input_size, units, input_scaling, spectral_radius,
                          leaky, connectivity_input, connectivity_recurrent,
                          seed=0):
    rng = np.random.default_rng(seed)
    kernel = sparse_tensor_init_np(input_size, units, connectivity_input, rng) * input_scaling
    W = sparse_recurrent_tensor_init_np(units, connectivity_recurrent, rng)
    if leaky == 1:
        W = spectral_norm_scaling_np(W, spectral_radius)
        recurrent_kernel = W
    else:
        I = np.eye(units, dtype=np.float32)
        W = W * leaky + I * (1.0 - leaky)
        W = spectral_norm_scaling_np(W, spectral_radius)
        recurrent_kernel = (W + I * (leaky - 1.0)) * (1.0 / leaky)
    bias = (rng.random(units).astype(np.float32) * 2.0 - 1.0) * input_scaling
    return (jnp.asarray(kernel, jnp.float32),
            jnp.asarray(recurrent_kernel, jnp.float32),
            jnp.asarray(bias, jnp.float32))


# --------------------------------- kernel ------------------------------------

def _round_up(x, m):
    return (x + m - 1) // m * m


def reservoir_chunk_kernel(u_ref, w_ref, hs_ref, h_carry, *, leaky, t_chunk):
    """One grid step = T_CHUNK timesteps of the recurrence.

    u_ref:   (T_CHUNK, B_pad, U_pad)  precomputed x_t @ K + b
    w_ref:   (U_pad, U_pad)           recurrent kernel (VMEM-resident)
    hs_ref:  (T_CHUNK, B_pad, U_pad)  output hidden-state slab for this chunk
    h_carry: (B_pad, U_pad)           VMEM carry of h across chunks
    """
    # init_hidden: h_0 = zeros on the first chunk only.
    @pl.when(pl.program_id(0) == 0)
    def _():
        h_carry[...] = jnp.zeros_like(h_carry)

    w = w_ref[...]  # load once per grid step; resident across steps

    def step(t, h):
        pre = u_ref[t] + jnp.dot(h, w, preferred_element_type=jnp.float32)
        out = jnp.tanh(pre)
        if leaky == 1.0:                       # static specialization (default path)
            h_new = out
        else:
            h_new = h * (1.0 - leaky) + out * leaky
        hs_ref[t] = h_new                      # full-sublane, lane-dense store
        return h_new

    h_carry[...] = lax.fori_loop(0, t_chunk, step, h_carry[...], unroll=True)


def deep_reservoir_forward(X, kernel, recurrent_kernel, bias, *, leaky=1.0,
                           t_chunk=None):
    """X: (B, T, D) float32. Returns (states (B,T,U), states_last (1,B,U))."""
    B, T, D = X.shape
    U = kernel.shape[1]

    # Lane-dense padding of the unit dimension (multiple of 128) and sublane
    # padding of the batch dimension (multiple of 8). Padded columns of
    # K/W/bias are zero, so padded hidden units stay exactly 0; padded batch
    # rows are dead work sliced away below.
    U_pad = _round_up(U, 128)
    B_pad = _round_up(B, 8)
    if t_chunk is None:
        t_chunk = min(_round_up(T, 8), 32)
    T_pad = _round_up(T, t_chunk)
    num_chunks = T_pad // t_chunk

    kern_p = jnp.zeros((D, U_pad), jnp.float32).at[:, :U].set(kernel.astype(jnp.float32))
    w_p = jnp.zeros((U_pad, U_pad), jnp.float32).at[:U, :U].set(
        recurrent_kernel.astype(jnp.float32))
    bias_p = jnp.zeros((U_pad,), jnp.float32).at[:U].set(bias.astype(jnp.float32))

    X_p = X.astype(jnp.float32)
    if B_pad != B:
        X_p = jnp.pad(X_p, ((0, B_pad - B), (0, 0), (0, 0)))

    # Hoisted input projection: one big MXU-friendly matmul, produced directly
    # in (T, B_pad, U_pad) layout so no separate transpose pass over X or the
    # projection is needed before the recurrence.
    u_proj = jnp.einsum("btd,du->tbu", X_p, kern_p,
                        preferred_element_type=jnp.float32) + bias_p[None, None, :]
    if T_pad != T:
        u_proj = jnp.pad(u_proj, ((0, T_pad - T), (0, 0), (0, 0)))

    hs = pl.pallas_call(
        functools.partial(reservoir_chunk_kernel, leaky=float(leaky),
                          t_chunk=t_chunk),
        out_shape=jax.ShapeDtypeStruct((T_pad, B_pad, U_pad), jnp.float32),
        grid_spec=pltpu.PrefetchScalarGridSpec(
            num_scalar_prefetch=0,
            grid=(num_chunks,),
            in_specs=[
                # per-chunk slab of the precomputed projection
                pl.BlockSpec((t_chunk, B_pad, U_pad), lambda c: (c, 0, 0)),
                # recurrent kernel, constant block index -> stays resident
                pl.BlockSpec((U_pad, U_pad), lambda c: (0, 0)),
            ],
            out_specs=pl.BlockSpec((t_chunk, B_pad, U_pad), lambda c: (c, 0, 0)),
            scratch_shapes=[pltpu.VMEM((B_pad, U_pad), jnp.float32)],  # h carry
        ),
        compiler_params=pltpu.CompilerParams(
            dimension_semantics=("arbitrary",),   # sequential recurrence over time
        ),
    )(u_proj, w_p)

    states = jnp.transpose(hs[:T, :B, :U], (1, 0, 2))            # (B, T, U)
    states_last = states[:, -1, :][None]                         # (L=1, B, U)
    return states, states_last


# ---------------------------- pure-JAX reference ------------------------------

def deep_reservoir_reference(X, kernel, recurrent_kernel, bias, *, leaky=1.0):
    B, T, D = X.shape
    U = kernel.shape[1]
    h = jnp.zeros((B, U), jnp.float32)
    hs = []
    for t in range(T):
        xt = X[:, t]
        out = jnp.tanh(xt @ kernel + bias + h @ recurrent_kernel)
        h = h * (1.0 - leaky) + out * leaky
        hs.append(h)
    states = jnp.stack(hs, axis=1)
    return states, states[:, -1, :][None]


# ----------------------------------- main -------------------------------------

if __name__ == "__main__":
    # small shapes consistent with the module
    B, T, D = 2, 8, 4
    tot_units = 32
    input_scaling = 0.5
    spectral_radius = 0.5
    connectivity_input = 4        # must be <= units for choice w/o replacement
    connectivity_recurrent = 8

    X = jax.random.normal(jax.random.PRNGKey(0), (B, T, D), dtype=jnp.float32)

    # Exercise both the leaky == 1 (default) path and the leaky != 1 path.
    for leaky in (1.0, 0.5):
        kernel, recurrent_kernel, bias = make_reservoir_params(
            input_size=D, units=tot_units, input_scaling=input_scaling,
            spectral_radius=spectral_radius, leaky=leaky,
            connectivity_input=connectivity_input,
            connectivity_recurrent=connectivity_recurrent, seed=0)

        states, states_last = deep_reservoir_forward(
            X, kernel, recurrent_kernel, bias, leaky=leaky)
        states = jax.block_until_ready(states)
        states_last = jax.block_until_ready(states_last)

        ref_states, ref_last = deep_reservoir_reference(
            X, kernel, recurrent_kernel, bias, leaky=leaky)
        np.testing.assert_allclose(np.asarray(states), np.asarray(ref_states),
                                   rtol=1e-5, atol=1e-5)
        np.testing.assert_allclose(np.asarray(states_last), np.asarray(ref_last),
                                   rtol=1e-5, atol=1e-5)

    print("KERNEL_OK")
</pallas_src>

<mosaic_0001>
module attributes {stable_mosaic.version = 11 : i64} {
  func.func @reservoir_chunk_kernel(%arg0: i32, %arg1: memref<8x8x128xf32, #tpu.memory_space<vmem>>, %arg2: memref<128x128xf32, #tpu.memory_space<vmem>>, %arg3: memref<8x8x128xf32, #tpu.memory_space<vmem>>, %arg4: memref<8x128xf32, #tpu.memory_space<vmem>>) attributes {dimension_semantics = [#tpu.dimension_semantics<arbitrary>], iteration_bounds = array<i64: 1>, scalar_prefetch = 0 : i64, scratch_operands = 1 : i64, tpu.core_type = #tpu.core_type<tc>, window_params = [{transform_indices = @transform_0, window_bounds = array<i64: 8, 8, 128>}, {pipeline_mode = #tpu.pipeline_mode<synchronous>, transform_indices = @transform_1, window_bounds = array<i64: 128, 128>}, {transform_indices = @transform_2, window_bounds = array<i64: 8, 8, 128>}]} {
    %c0_i32 = arith.constant 0 : i32
    %0 = arith.cmpi eq, %arg0, %c0_i32 : i32
    %1 = arith.extui %0 : i1 to i32
    %c0_i32_0 = arith.constant 0 : i32
    %2 = arith.cmpi ne, %1, %c0_i32_0 : i32
    scf.if %2 {
      %cst_46 = arith.constant 0.000000e+00 : f32
      %86 = vector.broadcast %cst_46 : f32 to vector<8x128xf32>
      %c0_47 = arith.constant 0 : index
      %c0_48 = arith.constant 0 : index
      %87 = vector.load %arg4[%c0_47, %c0_48] : memref<8x128xf32, #tpu.memory_space<vmem>>, vector<8x128xf32>
      tpu.vector_store %arg4[%c0_47, %c0_48], %86 {strides = array<i32>} : memref<8x128xf32, #tpu.memory_space<vmem>>, vector<8x128xf32>,
    } else {
    }
    %c0 = arith.constant 0 : index
    %c0_1 = arith.constant 0 : index
    %3 = vector.load %arg2[%c0, %c0_1] : memref<128x128xf32, #tpu.memory_space<vmem>>, vector<128x128xf32>
    %c0_2 = arith.constant 0 : index
    %c0_3 = arith.constant 0 : index
    %4 = vector.load %arg4[%c0_2, %c0_3] : memref<8x128xf32, #tpu.memory_space<vmem>>, vector<8x128xf32>
    %c0_i32_4 = arith.constant 0 : i32
    %5 = arith.index_cast %c0_i32_4 : i32 to index
    %c0_5 = arith.constant 0 : index
    %c0_6 = arith.constant 0 : index
    %6 = vector.load %arg1[%5, %c0_5, %c0_6] : memref<8x8x128xf32, #tpu.memory_space<vmem>>, vector<1x8x128xf32>
    %7 = vector.shape_cast %6 : vector<1x8x128xf32> to vector<8x128xf32>
    %cst = arith.constant dense<0.000000e+00> : vector<8x128xf32>
    %8 = tpu.matmul %4, %3, %cst {dimension_numbers = #tpu.dot_dimension_numbers<[1], [0], [0], [1], [0, 0, 1, 1], [], []>} : vector<8x128xf32>, vector<128x128xf32>, vector<8x128xf32> -> vector<8x128xf32>
    %9 = arith.addf %7, %8 : vector<8x128xf32>
    %10 = math.tanh %9 : vector<8x128xf32>
    %11 = arith.index_cast %c0_i32_4 : i32 to index
    %c0_7 = arith.constant 0 : index
    %c0_8 = arith.constant 0 : index
    %12 = vector.load %arg3[%11, %c0_7, %c0_8] : memref<8x8x128xf32, #tpu.memory_space<vmem>>, vector<1x8x128xf32>
    %13 = vector.shape_cast %12 : vector<1x8x128xf32> to vector<8x128xf32>
    %14 = vector.shape_cast %10 : vector<8x128xf32> to vector<1x8x128xf32>
    tpu.vector_store %arg3[%11, %c0_7, %c0_8], %14 {strides = array<i32>} : memref<8x8x128xf32, #tpu.memory_space<vmem>>, vector<1x8x128xf32>,
    %c1_i32 = arith.constant 1 : i32
    %15 = arith.index_cast %c1_i32 : i32 to index
    %c0_9 = arith.constant 0 : index
    %c0_10 = arith.constant 0 : index
    %16 = vector.load %arg1[%15, %c0_9, %c0_10] : memref<8x8x128xf32, #tpu.memory_space<vmem>>, vector<1x8x128xf32>
    %17 = vector.shape_cast %16 : vector<1x8x128xf32> to vector<8x128xf32>
    %cst_11 = arith.constant dense<0.000000e+00> : vector<8x128xf32>
    %18 = tpu.matmul %10, %3, %cst_11 {dimension_numbers = #tpu.dot_dimension_numbers<[1], [0], [0], [1], [0, 0, 1, 1], [], []>} : vector<8x128xf32>, vector<128x128xf32>, vector<8x128xf32> -> vector<8x128xf32>
    %19 = arith.addf %17, %18 : vector<8x128xf32>
    %20 = math.tanh %19 : vector<8x128xf32>
    %21 = arith.index_cast %c1_i32 : i32 to index
    %c0_12 = arith.constant 0 : index
    %c0_13 = arith.constant 0 : index
    %22 = vector.load %arg3[%21, %c0_12, %c0_13] : memref<8x8x128xf32, #tpu.memory_space<vmem>>, vector<1x8x128xf32>
    %23 = vector.shape_cast %22 : vector<1x8x128xf32> to vector<8x128xf32>
    %24 = vector.shape_cast %20 : vector<8x128xf32> to vector<1x8x128xf32>
    tpu.vector_store %arg3[%21, %c0_12, %c0_13], %24 {strides = array<i32>} : memref<8x8x128xf32, #tpu.memory_space<vmem>>, vector<1x8x128xf32>,
    %c2_i32 = arith.constant 2 : i32
    %25 = arith.index_cast %c2_i32 : i32 to index
    %c0_14 = arith.constant 0 : index
    %c0_15 = arith.constant 0 : index
    %26 = vector.load %arg1[%25, %c0_14, %c0_15] : memref<8x8x128xf32, #tpu.memory_space<vmem>>, vector<1x8x128xf32>
    %27 = vector.shape_cast %26 : vector<1x8x128xf32> to vector<8x128xf32>
    %cst_16 = arith.constant dense<0.000000e+00> : vector<8x128xf32>
    %28 = tpu.matmul %20, %3, %cst_16 {dimension_numbers = #tpu.dot_dimension_numbers<[1], [0], [0], [1], [0, 0, 1, 1], [], []>} : vector<8x128xf32>, vector<128x128xf32>, vector<8x128xf32> -> vector<8x128xf32>
    %29 = arith.addf %27, %28 : vector<8x128xf32>
    %30 = math.tanh %29 : vector<8x128xf32>
    %31 = arith.index_cast %c2_i32 : i32 to index
    %c0_17 = arith.constant 0 : index
    %c0_18 = arith.constant 0 : index
    %32 = vector.load %arg3[%31, %c0_17, %c0_18] : memref<8x8x128xf32, #tpu.memory_space<vmem>>, vector<1x8x128xf32>
    %33 = vector.shape_cast %32 : vector<1x8x128xf32> to vector<8x128xf32>
    %34 = vector.shape_cast %30 : vector<8x128xf32> to vector<1x8x128xf32>
    tpu.vector_store %arg3[%31, %c0_17, %c0_18], %34 {strides = array<i32>} : memref<8x8x128xf32, #tpu.memory_space<vmem>>, vector<1x8x128xf32>,
    %c3_i32 = arith.constant 3 : i32
    %35 = arith.index_cast %c3_i32 : i32 to index
    %c0_19 = arith.constant 0 : index
    %c0_20 = arith.constant 0 : index
    %36 = vector.load %arg1[%35, %c0_19, %c0_20] : memref<8x8x128xf32, #tpu.memory_space<vmem>>, vector<1x8x128xf32>
    %37 = vector.shape_cast %36 : vector<1x8x128xf32> to vector<8x128xf32>
    %cst_21 = arith.constant dense<0.000000e+00> : vector<8x128xf32>
    %38 = tpu.matmul %30, %3, %cst_21 {dimension_numbers = #tpu.dot_dimension_numbers<[1], [0], [0], [1], [0, 0, 1, 1], [], []>} : vector<8x128xf32>, vector<128x128xf32>, vector<8x128xf32> -> vector<8x128xf32>
    %39 = arith.addf %37, %38 : vector<8x128xf32>
    %40 = math.tanh %39 : vector<8x128xf32>
    %41 = arith.index_cast %c3_i32 : i32 to index
    %c0_22 = arith.constant 0 : index
    %c0_23 = arith.constant 0 : index
    %42 = vector.load %arg3[%41, %c0_22, %c0_23] : memref<8x8x128xf32, #tpu.memory_space<vmem>>, vector<1x8x128xf32>
    %43 = vector.shape_cast %42 : vector<1x8x128xf32> to vector<8x128xf32>
    %44 = vector.shape_cast %40 : vector<8x128xf32> to vector<1x8x128xf32>
    tpu.vector_store %arg3[%41, %c0_22, %c0_23], %44 {strides = array<i32>} : memref<8x8x128xf32, #tpu.memory_space<vmem>>, vector<1x8x128xf32>,
    %c4_i32 = arith.constant 4 : i32
    %45 = arith.index_cast %c4_i32 : i32 to index
    %c0_24 = arith.constant 0 : index
    %c0_25 = arith.constant 0 : index
    %46 = vector.load %arg1[%45, %c0_24, %c0_25] : memref<8x8x128xf32, #tpu.memory_space<vmem>>, vector<1x8x128xf32>
    %47 = vector.shape_cast %46 : vector<1x8x128xf32> to vector<8x128xf32>
    %cst_26 = arith.constant dense<0.000000e+00> : vector<8x128xf32>
    %48 = tpu.matmul %40, %3, %cst_26 {dimension_numbers = #tpu.dot_dimension_numbers<[1], [0], [0], [1], [0, 0, 1, 1], [], []>} : vector<8x128xf32>, vector<128x128xf32>, vector<8x128xf32> -> vector<8x128xf32>
    %49 = arith.addf %47, %48 : vector<8x128xf32>
    %50 = math.tanh %49 : vector<8x128xf32>
    %51 = arith.index_cast %c4_i32 : i32 to index
    %c0_27 = arith.constant 0 : index
    %c0_28 = arith.constant 0 : index
    %52 = vector.load %arg3[%51, %c0_27, %c0_28] : memref<8x8x128xf32, #tpu.memory_space<vmem>>, vector<1x8x128xf32>
    %53 = vector.shape_cast %52 : vector<1x8x128xf32> to vector<8x128xf32>
    %54 = vector.shape_cast %50 : vector<8x128xf32> to vector<1x8x128xf32>
    tpu.vector_store %arg3[%51, %c0_27, %c0_28], %54 {strides = array<i32>} : memref<8x8x128xf32, #tpu.memory_space<vmem>>, vector<1x8x128xf32>,
    %c5_i32 = arith.constant 5 : i32
    %55 = arith.index_cast %c5_i32 : i32 to index
    %c0_29 = arith.constant 0 : index
    %c0_30 = arith.constant 0 : index
    %56 = vector.load %arg1[%55, %c0_29, %c0_30] : memref<8x8x128xf32, #tpu.memory_space<vmem>>, vector<1x8x128xf32>
    %57 = vector.shape_cast %56 : vector<1x8x128xf32> to vector<8x128xf32>
    %cst_31 = arith.constant dense<0.000000e+00> : vector<8x128xf32>
    %58 = tpu.matmul %50, %3, %cst_31 {dimension_numbers = #tpu.dot_dimension_numbers<[1], [0], [0], [1], [0, 0, 1, 1], [], []>} : vector<8x128xf32>, vector<128x128xf32>, vector<8x128xf32> -> vector<8x128xf32>
    %59 = arith.addf %57, %58 : vector<8x128xf32>
    %60 = math.tanh %59 : vector<8x128xf32>
    %61 = arith.index_cast %c5_i32 : i32 to index
    %c0_32 = arith.constant 0 : index
    %c0_33 = arith.constant 0 : index
    %62 = vector.load %arg3[%61, %c0_32, %c0_33] : memref<8x8x128xf32, #tpu.memory_space<vmem>>, vector<1x8x128xf32>
    %63 = vector.shape_cast %62 : vector<1x8x128xf32> to vector<8x128xf32>
    %64 = vector.shape_cast %60 : vector<8x128xf32> to vector<1x8x128xf32>
    tpu.vector_store %arg3[%61, %c0_32, %c0_33], %64 {strides = array<i32>} : memref<8x8x128xf32, #tpu.memory_space<vmem>>, vector<1x8x128xf32>,
    %c6_i32 = arith.constant 6 : i32
    %65 = arith.index_cast %c6_i32 : i32 to index
    %c0_34 = arith.constant 0 : index
    %c0_35 = arith.constant 0 : index
    %66 = vector.load %arg1[%65, %c0_34, %c0_35] : memref<8x8x128xf32, #tpu.memory_space<vmem>>, vector<1x8x128xf32>
    %67 = vector.shape_cast %66 : vector<1x8x128xf32> to vector<8x128xf32>
    %cst_36 = arith.constant dense<0.000000e+00> : vector<8x128xf32>
    %68 = tpu.matmul %60, %3, %cst_36 {dimension_numbers = #tpu.dot_dimension_numbers<[1], [0], [0], [1], [0, 0, 1, 1], [], []>} : vector<8x128xf32>, vector<128x128xf32>, vector<8x128xf32> -> vector<8x128xf32>
    %69 = arith.addf %67, %68 : vector<8x128xf32>
    %70 = math.tanh %69 : vector<8x128xf32>
    %71 = arith.index_cast %c6_i32 : i32 to index
    %c0_37 = arith.constant 0 : index
    %c0_38 = arith.constant 0 : index
    %72 = vector.load %arg3[%71, %c0_37, %c0_38] : memref<8x8x128xf32, #tpu.memory_space<vmem>>, vector<1x8x128xf32>
    %73 = vector.shape_cast %72 : vector<1x8x128xf32> to vector<8x128xf32>
    %74 = vector.shape_cast %70 : vector<8x128xf32> to vector<1x8x128xf32>
    tpu.vector_store %arg3[%71, %c0_37, %c0_38], %74 {strides = array<i32>} : memref<8x8x128xf32, #tpu.memory_space<vmem>>, vector<1x8x128xf32>,
    %c7_i32 = arith.constant 7 : i32
    %75 = arith.index_cast %c7_i32 : i32 to index
    %c0_39 = arith.constant 0 : index
    %c0_40 = arith.constant 0 : index
    %76 = vector.load %arg1[%75, %c0_39, %c0_40] : memref<8x8x128xf32, #tpu.memory_space<vmem>>, vector<1x8x128xf32>
    %77 = vector.shape_cast %76 : vector<1x8x128xf32> to vector<8x128xf32>
    %cst_41 = arith.constant dense<0.000000e+00> : vector<8x128xf32>
    %78 = tpu.matmul %70, %3, %cst_41 {dimension_numbers = #tpu.dot_dimension_numbers<[1], [0], [0], [1], [0, 0, 1, 1], [], []>} : vector<8x128xf32>, vector<128x128xf32>, vector<8x128xf32> -> vector<8x128xf32>
    %79 = arith.addf %77, %78 : vector<8x128xf32>
    %80 = math.tanh %79 : vector<8x128xf32>
    %81 = arith.index_cast %c7_i32 : i32 to index
    %c0_42 = arith.constant 0 : index
    %c0_43 = arith.constant 0 : index
    %82 = vector.load %arg3[%81, %c0_42, %c0_43] : memref<8x8x128xf32, #tpu.memory_space<vmem>>, vector<1x8x128xf32>
    %83 = vector.shape_cast %82 : vector<1x8x128xf32> to vector<8x128xf32>
    %84 = vector.shape_cast %80 : vector<8x128xf32> to vector<1x8x128xf32>
    tpu.vector_store %arg3[%81, %c0_42, %c0_43], %84 {strides = array<i32>} : memref<8x8x128xf32, #tpu.memory_space<vmem>>, vector<1x8x128xf32>,
    %c8_i32 = arith.constant 8 : i32
    %c0_44 = arith.constant 0 : index
    %c0_45 = arith.constant 0 : index
    %85 = vector.load %arg4[%c0_44, %c0_45] : memref<8x128xf32, #tpu.memory_space<vmem>>, vector<8x128xf32>
    tpu.vector_store %arg4[%c0_44, %c0_45], %80 {strides = array<i32>} : memref<8x128xf32, #tpu.memory_space<vmem>>, vector<8x128xf32>,
    return
  }
  func.func @transform_0(%arg0: i32) -> (i32, i32, i32) {
    %c0_i32 = arith.constant 0 : i32
    %c0_i32_0 = arith.constant 0 : i32
    %c0_i32_1 = arith.constant 0 : i32
    return %arg0, %c0_i32, %c0_i32_0 : i32, i32, i32
  }
  func.func @transform_1(%arg0: i32) -> (i32, i32) {
    %c0_i32 = arith.constant 0 : i32
    %c0_i32_0 = arith.constant 0 : i32
    %c0_i32_1 = arith.constant 0 : i32
    return %c0_i32, %c0_i32_0 : i32, i32
  }
  func.func @transform_2(%arg0: i32) -> (i32, i32, i32) {
    %c0_i32 = arith.constant 0 : i32
    %c0_i32_0 = arith.constant 0 : i32
    %c0_i32_1 = arith.constant 0 : i32
    return %arg0, %c0_i32, %c0_i32_0 : i32, i32, i32
  }
}

</mosaic_0001>

<bundles_post_ra>
// kernel: tpu_custom_call.1
= control target key start
LH: loop header
LB: loop body
LE: loop exit
PB: predicated region body
PF: predicated region fallthrough
CT: control target
= control target key end

     0   :  { %7 = vsyncpa [#allocation4], 0  ;;  %s1537_s0 = inlined_call_operand.hbm [shape: f32[8,8,128], index: 0, kind: input, shape index: {}]   ;;  %s1538_s1 = inlined_call_operand.hbm [shape: f32[128,128], index: 1, kind: input, shape index: {}]   ;;  %s1539_s2 = inlined_call_operand.hbm [shape: f32[8,8,128], index: 2, kind: output, shape index: {}]  }
   0x1   :  { %8 = vsyncpa [#allocation7], 0 }
   0x2   :  { %9 = vsyncpa [#allocation5], 0  ;;  %s1192_s9 = smov [#allocation3]  }
   0x3   :  { %s15_s10 = sshll.u32 %s1192_s9, 4  ;;  %s16_s10 = int_to_ptr.vmem [resolvable:$true] %s15_s10 }
   0x4   :  { %s1134_s11 = scalar_lea.vmem %s16_s10, 1024  ;;  %p1139_p1 = scmp.lt.s32.totalorder %s16_s10, %s16_s10 }
   0x5   :  { %p1135_p0 = scmp.ne.s32.totalorder %s16_s10, %s1134_s11  ;;  %p1140_p2 = scmp.lt.s32.totalorder %s1134_s11, %s1134_s11 }
   0x7   :  { %p1141_p3 = por %p1140_p2, %p1139_p1 }
   0x9   :  { %p1142_p4 = pnand %p1141_p3, %p1135_p0 }
   0xb   :  { %1145 = shalt.err (!%p1142_p4)
}
   0xc   :  { %s1193_s12 = smov 128   ;;  %s1194_s13 = smov 8  }
   0xd   :  { %21 = dma.hbm_to_vmem [thread:$0]  %s1537_s0, 1024, %s16_s10, [#allocation4], %s1193_s12, %s1193_s12, %s1194_s13  }
   0xe   :  { %s1195_s16 = smov [#allocation6]  }
   0xf   :  { %s27_s17 = sshll.u32 %s1195_s16, 4  ;;  %s28_s17 = int_to_ptr.vmem [resolvable:$true] %s27_s17 }
  0x10   :  { %s1154_s18 = scalar_lea.vmem %s28_s17, 2048  ;;  %p1159_p6 = scmp.lt.s32.totalorder %s28_s17, %s28_s17 }
  0x11   :  { %p1155_p5 = scmp.ne.s32.totalorder %s28_s17, %s1154_s18  ;;  %p1160_p7 = scmp.lt.s32.totalorder %s1154_s18, %s1154_s18 }
  0x13   :  { %p1161_p8 = por %p1160_p7, %p1159_p6 }
  0x15   :  { %p1162_p9 = pnand %p1161_p8, %p1155_p5 }
  0x17   :  { %1165 = shalt.err (!%p1162_p9)
}
  0x18   :  { %33 = dma.hbm_to_vmem [thread:$0]  %s1538_s1, 2048, %s28_s17, [#allocation7], %s1193_s12, %s1193_s12, %s1194_s13  }
  0x19   :  { %1186 = dma.done.wait [#allocation4], 1024  }
  0x1a   :  { %1187 = vsyncadd [#allocation4], 4294966272 }
  0x1b   :  { %1188 = dma.done.wait [#allocation7], 2048  }
  0x1c   :  { %1189 = vsyncadd [#allocation7], 4294965248  ;;  %v1196_v0 = vmov 0.0   ;;  %vm1197_vm0 = vmmov 0   ;;  %v1232_v1 = vld [vmem:[#allocation6 + $0x78] sm:$0xff]  ;;  %v1234_v2 = vld [vmem:[#allocation6 + $0x70] sm:$0xff] }
  0x1d   :  { %823 = vmatprep.subr.mxu0 %v1196_v0  ;;  %855 = vmatprep.mubr.msk.f32.mxu0 %vm1197_vm0, %v1196_v0  ;;  %v1239_v3 = vld [vmem:[#allocation6 + $0x68] sm:$0xff]  ;;  %v1245_v4 = vld [vmem:[#allocation6 + $0x60] sm:$0xff]  ;;  %v1251_v5 = vld [vmem:[#allocation6 + $0x58] sm:$0xff]  ;;  %s1198_s0 = smov [#allocation8]  }
  0x1e   :  { %858 = vmatprep.subr.mxu1 %v1196_v0  ;;  %890 = vmatprep.mubr.msk.f32.mxu1 %vm1197_vm0, %v1196_v0  ;;  %v1257_v6 = vld [vmem:[#allocation6 + $0x50] sm:$0xff]  ;;  %v1263_v7 = vld [vmem:[#allocation6 + $0x48] sm:$0xff]  ;;  %v1269_v8 = vld [vmem:[#allocation6 + $0x40] sm:$0xff]  ;;  %s674_s1 = sshll.u32 %s1198_s0, 4  ;;  %s675_s1 = int_to_ptr.vmem [resolvable:$true] %s674_s1 }
  0x1f   :  { %824 = vmatpush3.msra.mxu0 %v1232_v1  ;;  %859 = vmatpush3.msra.mxu1 %v1232_v1  ;;  %v1275_v9 = vld [vmem:[#allocation6 + $0x38] sm:$0xff]  ;;  %v1281_v10 = vld [vmem:[#allocation6 + $0x30] sm:$0xff]  ;;  %v1287_v11 = vld [vmem:[#allocation6 + $0x28] sm:$0xff]  ;;  %s1166_s21 = scalar_lea.vmem %s675_s1, 1024  ;;  %p1171_p11 = scmp.lt.s32.totalorder %s675_s1, %s675_s1 }
  0x20   :  { %825 = vmatprep.subr.mxu0 %v1196_v0  ;;  %860 = vmatprep.subr.mxu1 %v1196_v0  ;;  %v1293_v12 = vld [vmem:[#allocation6 + $0x20] sm:$0xff]  ;;  %v1299_v13 = vld [vmem:[#allocation6 + $0x18] sm:$0xff]  ;;  %v1305_v14 = vld [vmem:[#allocation6 + $0x10] sm:$0xff]  ;;  %p1167_p10 = scmp.ne.s32.totalorder %s675_s1, %s1166_s21  ;;  %p1172_p12 = scmp.lt.s32.totalorder %s1166_s21, %s1166_s21 }
  0x21   :  { %826 = vmatpush3.msra.mxu0 %v1234_v2  ;;  %861 = vmatpush3.msra.mxu1 %v1234_v2  ;;  %v1311_v15 = vld [vmem:[#allocation6 + $0x8] sm:$0xff]  ;;  %v1317_v16 = vld [vmem:[#allocation6] sm:$0xff]  ;;  %v213_v27 = vld [vmem:[#allocation3 + $0x10] sm:$0xff] }
  0x22   :  { %827 = vmatprep.subr.mxu0 %v1196_v0  ;;  %862 = vmatprep.subr.mxu1 %v1196_v0  ;;  %v62_v17 = vld [vmem:[#allocation3] sm:$0xff]  ;;  %v137_v22 = vld [vmem:[#allocation3 + $0x8] sm:$0xff]  ;;  %v289_v32 = vld [vmem:[#allocation3 + $0x18] sm:$0xff]  ;;  %p1173_p13 = por %p1172_p12, %p1171_p11 }
  0x23   :  { %828 = vmatpush3.msra.mxu0 %v1239_v3  ;;  %863 = vmatpush3.msra.mxu1 %v1239_v3  ;;  %v365_v37 = vld [vmem:[#allocation3 + $0x20] sm:$0xff]  ;;  %v441_v42 = vld [vmem:[#allocation3 + $0x28] sm:$0xff]  ;;  %v517_v47 = vld [vmem:[#allocation3 + $0x30] sm:$0xff] }
  0x24   :  { %829 = vmatprep.subr.mxu0 %v1196_v0  ;;  %864 = vmatprep.subr.mxu1 %v1196_v0  ;;  %v593_v52 = vld [vmem:[#allocation3 + $0x38] sm:$0xff]  ;;  %p1174_p0 = pnand %p1173_p13, %p1167_p10 }
  0x25   :  { %830 = vmatpush3.msra.mxu0 %v1245_v4  ;;  %865 = vmatpush3.msra.mxu1 %v1245_v4 }
  0x26   :  { %831 = vmatprep.subr.mxu0 %v1196_v0  ;;  %866 = vmatprep.subr.mxu1 %v1196_v0 }
  0x27   :  { %832 = vmatpush3.msra.mxu0 %v1251_v5  ;;  %867 = vmatpush3.msra.mxu1 %v1251_v5 }
  0x28   :  { %833 = vmatprep.subr.mxu0 %v1196_v0  ;;  %868 = vmatprep.subr.mxu1 %v1196_v0 }
  0x29   :  { %834 = vmatpush3.msra.mxu0 %v1257_v6  ;;  %869 = vmatpush3.msra.mxu1 %v1257_v6 }
  0x2a   :  { %835 = vmatprep.subr.mxu0 %v1196_v0  ;;  %870 = vmatprep.subr.mxu1 %v1196_v0 }
  0x2b   :  { %836 = vmatpush3.msra.mxu0 %v1263_v7  ;;  %871 = vmatpush3.msra.mxu1 %v1263_v7 }
  0x2c   :  { %837 = vmatprep.subr.mxu0 %v1196_v0  ;;  %872 = vmatprep.subr.mxu1 %v1196_v0 }
  0x2d   :  { %838 = vmatpush3.msra.mxu0 %v1269_v8  ;;  %873 = vmatpush3.msra.mxu1 %v1269_v8 }
  0x2e   :  { %839 = vmatprep.subr.mxu0 %v1196_v0  ;;  %874 = vmatprep.subr.mxu1 %v1196_v0 }
  0x2f   :  { %840 = vmatpush3.msra.mxu0 %v1275_v9  ;;  %875 = vmatpush3.msra.mxu1 %v1275_v9 }
  0x30   :  { %841 = vmatprep.subr.mxu0 %v1196_v0  ;;  %876 = vmatprep.subr.mxu1 %v1196_v0 }
  0x31   :  { %842 = vmatpush3.msra.mxu0 %v1281_v10  ;;  %877 = vmatpush3.msra.mxu1 %v1281_v10 }
  0x32   :  { %843 = vmatprep.subr.mxu0 %v1196_v0  ;;  %878 = vmatprep.subr.mxu1 %v1196_v0 }
  0x33   :  { %844 = vmatpush3.msra.mxu0 %v1287_v11  ;;  %879 = vmatpush3.msra.mxu1 %v1287_v11 }
  0x34   :  { %845 = vmatprep.subr.mxu0 %v1196_v0  ;;  %880 = vmatprep.subr.mxu1 %v1196_v0 }
  0x35   :  { %846 = vmatpush3.msra.mxu0 %v1293_v12  ;;  %881 = vmatpush3.msra.mxu1 %v1293_v12 }
  0x36   :  { %847 = vmatprep.subr.mxu0 %v1196_v0  ;;  %882 = vmatprep.subr.mxu1 %v1196_v0 }
  0x37   :  { %848 = vmatpush3.msra.mxu0 %v1299_v13  ;;  %883 = vmatpush3.msra.mxu1 %v1299_v13 }
  0x38   :  { %849 = vmatprep.subr.mxu0 %v1196_v0  ;;  %884 = vmatprep.subr.mxu1 %v1196_v0 }
  0x39   :  { %850 = vmatpush3.msra.mxu0 %v1305_v14  ;;  %885 = vmatpush3.msra.mxu1 %v1305_v14 }
  0x3a   :  { %851 = vmatprep.subr.mxu0 %v1196_v0  ;;  %886 = vmatprep.subr.mxu1 %v1196_v0 }
  0x3b   :  { %852 = vmatpush3.msra.mxu0 %v1311_v15  ;;  %887 = vmatpush3.msra.mxu1 %v1311_v15 }
  0x3c   :  { %853 = vmatprep.subr.mxu0 %v1196_v0  ;;  %888 = vmatprep.subr.mxu1 %v1196_v0 }
  0x3d   :  { %854 = vmatpush3.msra.mxu0 %v1317_v16  ;;  %889 = vmatpush3.msra.mxu1 %v1317_v16 }
  0x3e   :  { %856 = vmatmul.mubr.f32.vlgmr.msra.gmra.mxu0 %v1196_v0  ;;  %893 = vmatprep.subr.mxu0 %v1196_v0 }
  0x3f   :  { %894 = vmatpush3.msra.mxu0 %v1232_v1  ;;  %925 = vmatprep.mubr.msk.f32.mxu0 %vm1197_vm0, %v1196_v0 }
  0x40   :  { %895 = vmatprep.subr.mxu0 %v1196_v0  ;;  %928 = vmatprep.subr.mxu1 %v1196_v0 }
  0x41   :  { %896 = vmatpush3.msra.mxu0 %v1234_v2 }
  0x42   :  { %897 = vmatprep.subr.mxu0 %v1196_v0 }
  0x43   :  { %898 = vmatpush3.msra.mxu0 %v1239_v3 }
  0x44   :  { %899 = vmatprep.subr.mxu0 %v1196_v0 }
  0x45   :  { %900 = vmatpush3.msra.mxu0 %v1245_v4 }
  0x46   :  { %901 = vmatprep.subr.mxu0 %v1196_v0 }
  0x47   :  { %902 = vmatpush3.msra.mxu0 %v1251_v5 }
  0x48   :  { %903 = vmatprep.subr.mxu0 %v1196_v0 }
  0x49   :  { %904 = vmatpush3.msra.mxu0 %v1257_v6 }
  0x4a   :  { %905 = vmatprep.subr.mxu0 %v1196_v0 }
  0x4b   :  { %906 = vmatpush3.msra.mxu0 %v1263_v7 }
  0x4c   :  { %907 = vmatprep.subr.mxu0 %v1196_v0 }
  0x4d   :  { %908 = vmatpush3.msra.mxu0 %v1269_v8 }
  0x4e   :  { %909 = vmatprep.subr.mxu0 %v1196_v0 }
  0x4f   :  { %910 = vmatpush3.msra.mxu0 %v1275_v9 }
  0x50   :  { %911 = vmatprep.subr.mxu0 %v1196_v0 }
  0x51   :  { %912 = vmatpush3.msra.mxu0 %v1281_v10 }
  0x52   :  { %913 = vmatprep.subr.mxu0 %v1196_v0 }
  0x53   :  { %914 = vmatpush3.msra.mxu0 %v1287_v11 }
  0x54   :  { %915 = vmatprep.subr.mxu0 %v1196_v0 }
  0x55   :  { %916 = vmatpush3.msra.mxu0 %v1293_v12 }
  0x56   :  { %917 = vmatprep.subr.mxu0 %v1196_v0 }
  0x57   :  { %918 = vmatpush3.msra.mxu0 %v1299_v13 }
  0x58   :  { %919 = vmatprep.subr.mxu0 %v1196_v0 }
  0x59   :  { %920 = vmatpush3.msra.mxu0 %v1305_v14 }
  0x5a   :  { %921 = vmatprep.subr.mxu0 %v1196_v0 }
  0x5b   :  { %922 = vmatpush3.msra.mxu0 %v1311_v15 }
  0x5c   :  { %923 = vmatprep.subr.mxu0 %v1196_v0 }
  0x5d   :  { %924 = vmatpush3.msra.mxu0 %v1317_v16 }
  0x5e   :  { %963 = vmatprep.subr.mxu0 %v1196_v0 }
  0xfe   :  { %v129_v18 = vpop.f32.mrf.mxu0 }
  0xff   :  { %v133_v19 = vadd.f32 %v129_v18, %v62_v17 }
 0x100   :  { %v857_v20 = vpop.f32.mrf.mxu0 }
 0x101   :  { %1110 = vtanh.f32 %v133_v19 }
 0x10e   :  { %v1111_v21 = vpop.eup %1110 }
 0x10f   :  { %135 = vst [vmem:[#allocation8] sm:$0xff] %v1111_v21  ;;  %891 = vmatmul.mubr.f32.vlgmr.msra.gmra.mxu1 %v1111_v21 }
 0x110   :  { %929 = vmatpush3.msra.mxu1 %v1232_v1  ;;  %960 = vmatprep.mubr.msk.f32.mxu1 %vm1197_vm0, %v1196_v0 }
 0x111   :  { %930 = vmatprep.subr.mxu1 %v1196_v0 }
 0x112   :  { %931 = vmatpush3.msra.mxu1 %v1234_v2 }
 0x113   :  { %932 = vmatprep.subr.mxu1 %v1196_v0 }
 0x114   :  { %933 = vmatpush3.msra.mxu1 %v1239_v3 }
 0x115   :  { %934 = vmatprep.subr.mxu1 %v1196_v0 }
 0x116   :  { %935 = vmatpush3.msra.mxu1 %v1245_v4 }
 0x117   :  { %936 = vmatprep.subr.mxu1 %v1196_v0 }
 0x118   :  { %937 = vmatpush3.msra.mxu1 %v1251_v5 }
 0x119   :  { %938 = vmatprep.subr.mxu1 %v1196_v0 }
 0x11a   :  { %939 = vmatpush3.msra.mxu1 %v1257_v6 }
 0x11b   :  { %940 = vmatprep.subr.mxu1 %v1196_v0 }
 0x11c   :  { %941 = vmatpush3.msra.mxu1 %v1263_v7 }
 0x11d   :  { %942 = vmatprep.subr.mxu1 %v1196_v0 }
 0x11e   :  { %943 = vmatpush3.msra.mxu1 %v1269_v8 }
 0x11f   :  { %944 = vmatprep.subr.mxu1 %v1196_v0 }
 0x120   :  { %945 = vmatpush3.msra.mxu1 %v1275_v9 }
 0x121   :  { %946 = vmatprep.subr.mxu1 %v1196_v0 }
 0x122   :  { %947 = vmatpush3.msra.mxu1 %v1281_v10 }
 0x123   :  { %948 = vmatprep.subr.mxu1 %v1196_v0 }
 0x124   :  { %949 = vmatpush3.msra.mxu1 %v1287_v11 }
 0x125   :  { %950 = vmatprep.subr.mxu1 %v1196_v0 }
 0x126   :  { %951 = vmatpush3.msra.mxu1 %v1293_v12 }
 0x127   :  { %952 = vmatprep.subr.mxu1 %v1196_v0 }
 0x128   :  { %953 = vmatpush3.msra.mxu1 %v1299_v13 }
 0x129   :  { %954 = vmatprep.subr.mxu1 %v1196_v0 }
 0x12a   :  { %955 = vmatpush3.msra.mxu1 %v1305_v14 }
 0x12b   :  { %956 = vmatprep.subr.mxu1 %v1196_v0 }
 0x12c   :  { %957 = vmatpush3.msra.mxu1 %v1311_v15 }
 0x12d   :  { %958 = vmatprep.subr.mxu1 %v1196_v0 }
 0x12e   :  { %959 = vmatpush3.msra.mxu1 %v1317_v16 }
 0x12f   :  { %998 = vmatprep.subr.mxu1 %v1196_v0 }
 0x1cf   :  { %v204_v23 = vpop.f32.mrf.mxu1 }
 0x1d0   :  { %v208_v24 = vadd.f32 %v204_v23, %v137_v22 }
 0x1d1   :  { %v892_v25 = vpop.f32.mrf.mxu1 }
 0x1d2   :  { %1112 = vtanh.f32 %v208_v24 }
 0x1df   :  { %v1113_v26 = vpop.eup %1112 }
 0x1e0   :  { %211 = vst [vmem:[#allocation8 + $0x8] sm:$0xff] %v1113_v26  ;;  %926 = vmatmul.mubr.f32.vlgmr.msra.gmra.mxu0 %v1113_v26 }
 0x1e1   :  { %964 = vmatpush3.msra.mxu0 %v1232_v1  ;;  %995 = vmatprep.mubr.msk.f32.mxu0 %vm1197_vm0, %v1196_v0 }
 0x1e2   :  { %965 = vmatprep.subr.mxu0 %v1196_v0 }
 0x1e3   :  { %966 = vmatpush3.msra.mxu0 %v1234_v2 }
 0x1e4   :  { %967 = vmatprep.subr.mxu0 %v1196_v0 }
 0x1e5   :  { %968 = vmatpush3.msra.mxu0 %v1239_v3 }
 0x1e6   :  { %969 = vmatprep.subr.mxu0 %v1196_v0 }
 0x1e7   :  { %970 = vmatpush3.msra.mxu0 %v1245_v4 }
 0x1e8   :  { %971 = vmatprep.subr.mxu0 %v1196_v0 }
 0x1e9   :  { %972 = vmatpush3.msra.mxu0 %v1251_v5 }
 0x1ea   :  { %973 = vmatprep.subr.mxu0 %v1196_v0 }
 0x1eb   :  { %974 = vmatpush3.msra.mxu0 %v1257_v6 }
 0x1ec   :  { %975 = vmatprep.subr.mxu0 %v1196_v0 }
 0x1ed   :  { %976 = vmatpush3.msra.mxu0 %v1263_v7 }
 0x1ee   :  { %977 = vmatprep.subr.mxu0 %v1196_v0 }
 0x1ef   :  { %978 = vmatpush3.msra.mxu0 %v1269_v8 }
 0x1f0   :  { %979 = vmatprep.subr.mxu0 %v1196_v0 }
 0x1f1   :  { %980 = vmatpush3.msra.mxu0 %v1275_v9 }
 0x1f2   :  { %981 = vmatprep.subr.mxu0 %v1196_v0 }
 0x1f3   :  { %982 = vmatpush3.msra.mxu0 %v1281_v10 }
 0x1f4   :  { %983 = vmatprep.subr.mxu0 %v1196_v0 }
 0x1f5   :  { %984 = vmatpush3.msra.mxu0 %v1287_v11 }
 0x1f6   :  { %985 = vmatprep.subr.mxu0 %v1196_v0 }
 0x1f7   :  { %986 = vmatpush3.msra.mxu0 %v1293_v12 }
 0x1f8   :  { %987 = vmatprep.subr.mxu0 %v1196_v0 }
 0x1f9   :  { %988 = vmatpush3.msra.mxu0 %v1299_v13 }
 0x1fa   :  { %989 = vmatprep.subr.mxu0 %v1196_v0 }
 0x1fb   :  { %990 = vmatpush3.msra.mxu0 %v1305_v14 }
 0x1fc   :  { %991 = vmatprep.subr.mxu0 %v1196_v0 }
 0x1fd   :  { %992 = vmatpush3.msra.mxu0 %v1311_v15 }
 0x1fe   :  { %993 = vmatprep.subr.mxu0 %v1196_v0 }
 0x1ff   :  { %994 = vmatpush3.msra.mxu0 %v1317_v16 }
 0x200   :  { %1033 = vmatprep.subr.mxu0 %v1196_v0 }
 0x2a0   :  { %v280_v28 = vpop.f32.mrf.mxu0 }
 0x2a1   :  { %v284_v29 = vadd.f32 %v280_v28, %v213_v27 }
 0x2a2   :  { %v927_v30 = vpop.f32.mrf.mxu0 }
 0x2a3   :  { %1114 = vtanh.f32 %v284_v29 }
 0x2b0   :  { %v1115_v31 = vpop.eup %1114 }
 0x2b1   :  { %287 = vst [vmem:[#allocation8 + $0x10] sm:$0xff] %v1115_v31  ;;  %961 = vmatmul.mubr.f32.vlgmr.msra.gmra.mxu1 %v1115_v31 }
 0x2b2   :  { %999 = vmatpush3.msra.mxu1 %v1232_v1  ;;  %1030 = vmatprep.mubr.msk.f32.mxu1 %vm1197_vm0, %v1196_v0 }
 0x2b3   :  { %1000 = vmatprep.subr.mxu1 %v1196_v0 }
 0x2b4   :  { %1001 = vmatpush3.msra.mxu1 %v1234_v2 }
 0x2b5   :  { %1002 = vmatprep.subr.mxu1 %v1196_v0 }
 0x2b6   :  { %1003 = vmatpush3.msra.mxu1 %v1239_v3 }
 0x2b7   :  { %1004 = vmatprep.subr.mxu1 %v1196_v0 }
 0x2b8   :  { %1005 = vmatpush3.msra.mxu1 %v1245_v4 }
 0x2b9   :  { %1006 = vmatprep.subr.mxu1 %v1196_v0 }
 0x2ba   :  { %1007 = vmatpush3.msra.mxu1 %v1251_v5 }
 0x2bb   :  { %1008 = vmatprep.subr.mxu1 %v1196_v0 }
 0x2bc   :  { %1009 = vmatpush3.msra.mxu1 %v1257_v6 }
 0x2bd   :  { %1010 = vmatprep.subr.mxu1 %v1196_v0 }
 0x2be   :  { %1011 = vmatpush3.msra.mxu1 %v1263_v7 }
 0x2bf   :  { %1012 = vmatprep.subr.mxu1 %v1196_v0 }
 0x2c0   :  { %1013 = vmatpush3.msra.mxu1 %v1269_v8 }
 0x2c1   :  { %1014 = vmatprep.subr.mxu1 %v1196_v0 }
 0x2c2   :  { %1015 = vmatpush3.msra.mxu1 %v1275_v9 }
 0x2c3   :  { %1016 = vmatprep.subr.mxu1 %v1196_v0 }
 0x2c4   :  { %1017 = vmatpush3.msra.mxu1 %v1281_v10 }
 0x2c5   :  { %1018 = vmatprep.subr.mxu1 %v1196_v0 }
 0x2c6   :  { %1019 = vmatpush3.msra.mxu1 %v1287_v11 }
 0x2c7   :  { %1020 = vmatprep.subr.mxu1 %v1196_v0 }
 0x2c8   :  { %1021 = vmatpush3.msra.mxu1 %v1293_v12 }
 0x2c9   :  { %1022 = vmatprep.subr.mxu1 %v1196_v0 }
 0x2ca   :  { %1023 = vmatpush3.msra.mxu1 %v1299_v13 }
 0x2cb   :  { %1024 = vmatprep.subr.mxu1 %v1196_v0 }
 0x2cc   :  { %1025 = vmatpush3.msra.mxu1 %v1305_v14 }
 0x2cd   :  { %1026 = vmatprep.subr.mxu1 %v1196_v0 }
 0x2ce   :  { %1027 = vmatpush3.msra.mxu1 %v1311_v15 }
 0x2cf   :  { %1028 = vmatprep.subr.mxu1 %v1196_v0 }
 0x2d0   :  { %1029 = vmatpush3.msra.mxu1 %v1317_v16 }
 0x2d1   :  { %1068 = vmatprep.subr.mxu1 %v1196_v0 }
 0x371   :  { %v356_v33 = vpop.f32.mrf.mxu1 }
 0x372   :  { %v360_v34 = vadd.f32 %v356_v33, %v289_v32 }
 0x373   :  { %v962_v35 = vpop.f32.mrf.mxu1 }
 0x374   :  { %1116 = vtanh.f32 %v360_v34 }
 0x381   :  { %v1117_v36 = vpop.eup %1116 }
 0x382   :  { %363 = vst [vmem:[#allocation8 + $0x18] sm:$0xff] %v1117_v36  ;;  %996 = vmatmul.mubr.f32.vlgmr.msra.gmra.mxu0 %v1117_v36 }
 0x383   :  { %1034 = vmatpush3.msra.mxu0 %v1232_v1  ;;  %1065 = vmatprep.mubr.msk.f32.mxu0 %vm1197_vm0, %v1196_v0 }
 0x384   :  { %1035 = vmatprep.subr.mxu0 %v1196_v0 }
 0x385   :  { %1036 = vmatpush3.msra.mxu0 %v1234_v2 }
 0x386   :  { %1037 = vmatprep.subr.mxu0 %v1196_v0 }
 0x387   :  { %1038 = vmatpush3.msra.mxu0 %v1239_v3 }
 0x388   :  { %1039 = vmatprep.subr.mxu0 %v1196_v0 }
 0x389   :  { %1040 = vmatpush3.msra.mxu0 %v1245_v4 }
 0x38a   :  { %1041 = vmatprep.subr.mxu0 %v1196_v0 }
 0x38b   :  { %1042 = vmatpush3.msra.mxu0 %v1251_v5 }
 0x38c   :  { %1043 = vmatprep.subr.mxu0 %v1196_v0 }
 0x38d   :  { %1044 = vmatpush3.msra.mxu0 %v1257_v6 }
 0x38e   :  { %1045 = vmatprep.subr.mxu0 %v1196_v0 }
 0x38f   :  { %1046 = vmatpush3.msra.mxu0 %v1263_v7 }
 0x390   :  { %1047 = vmatprep.subr.mxu0 %v1196_v0 }
 0x391   :  { %1048 = vmatpush3.msra.mxu0 %v1269_v8 }
 0x392   :  { %1049 = vmatprep.subr.mxu0 %v1196_v0 }
 0x393   :  { %1050 = vmatpush3.msra.mxu0 %v1275_v9 }
 0x394   :  { %1051 = vmatprep.subr.mxu0 %v1196_v0 }
 0x395   :  { %1052 = vmatpush3.msra.mxu0 %v1281_v10 }
 0x396   :  { %1053 = vmatprep.subr.mxu0 %v1196_v0 }
 0x397   :  { %1054 = vmatpush3.msra.mxu0 %v1287_v11 }
 0x398   :  { %1055 = vmatprep.subr.mxu0 %v1196_v0 }
 0x399   :  { %1056 = vmatpush3.msra.mxu0 %v1293_v12 }
 0x39a   :  { %1057 = vmatprep.subr.mxu0 %v1196_v0 }
 0x39b   :  { %1058 = vmatpush3.msra.mxu0 %v1299_v13 }
 0x39c   :  { %1059 = vmatprep.subr.mxu0 %v1196_v0 }
 0x39d   :  { %1060 = vmatpush3.msra.mxu0 %v1305_v14 }
 0x39e   :  { %1061 = vmatprep.subr.mxu0 %v1196_v0 }
 0x39f   :  { %1062 = vmatpush3.msra.mxu0 %v1311_v15 }
 0x3a0   :  { %1063 = vmatprep.subr.mxu0 %v1196_v0 }
 0x3a1   :  { %1064 = vmatpush3.msra.mxu0 %v1317_v16 }
 0x442   :  { %v432_v38 = vpop.f32.mrf.mxu0 }
 0x443   :  { %v436_v39 = vadd.f32 %v432_v38, %v365_v37 }
 0x444   :  { %v997_v40 = vpop.f32.mrf.mxu0 }
 0x445   :  { %1118 = vtanh.f32 %v436_v39 }
 0x452   :  { %v1119_v41 = vpop.eup %1118 }
 0x453   :  { %439 = vst [vmem:[#allocation8 + $0x20] sm:$0xff] %v1119_v41  ;;  %1031 = vmatmul.mubr.f32.vlgmr.msra.gmra.mxu1 %v1119_v41 }
 0x454   :  { %1069 = vmatpush3.msra.mxu1 %v1232_v1  ;;  %1100 = vmatprep.mubr.msk.f32.mxu1 %vm1197_vm0, %v1196_v0 }
 0x455   :  { %1070 = vmatprep.subr.mxu1 %v1196_v0 }
 0x456   :  { %1071 = vmatpush3.msra.mxu1 %v1234_v2 }
 0x457   :  { %1072 = vmatprep.subr.mxu1 %v1196_v0 }
 0x458   :  { %1073 = vmatpush3.msra.mxu1 %v1239_v3 }
 0x459   :  { %1074 = vmatprep.subr.mxu1 %v1196_v0 }
 0x45a   :  { %1075 = vmatpush3.msra.mxu1 %v1245_v4 }
 0x45b   :  { %1076 = vmatprep.subr.mxu1 %v1196_v0 }
 0x45c   :  { %1077 = vmatpush3.msra.mxu1 %v1251_v5 }
 0x45d   :  { %1078 = vmatprep.subr.mxu1 %v1196_v0 }
 0x45e   :  { %1079 = vmatpush3.msra.mxu1 %v1257_v6 }
 0x45f   :  { %1080 = vmatprep.subr.mxu1 %v1196_v0 }
 0x460   :  { %1081 = vmatpush3.msra.mxu1 %v1263_v7 }
 0x461   :  { %1082 = vmatprep.subr.mxu1 %v1196_v0 }
 0x462   :  { %1083 = vmatpush3.msra.mxu1 %v1269_v8 }
 0x463   :  { %1084 = vmatprep.subr.mxu1 %v1196_v0 }
 0x464   :  { %1085 = vmatpush3.msra.mxu1 %v1275_v9 }
 0x465   :  { %1086 = vmatprep.subr.mxu1 %v1196_v0 }
 0x466   :  { %1087 = vmatpush3.msra.mxu1 %v1281_v10 }
 0x467   :  { %1088 = vmatprep.subr.mxu1 %v1196_v0 }
 0x468   :  { %1089 = vmatpush3.msra.mxu1 %v1287_v11 }
 0x469   :  { %1090 = vmatprep.subr.mxu1 %v1196_v0 }
 0x46a   :  { %1091 = vmatpush3.msra.mxu1 %v1293_v12 }
 0x46b   :  { %1092 = vmatprep.subr.mxu1 %v1196_v0 }
 0x46c   :  { %1093 = vmatpush3.msra.mxu1 %v1299_v13 }
 0x46d   :  { %1094 = vmatprep.subr.mxu1 %v1196_v0 }
 0x46e   :  { %1095 = vmatpush3.msra.mxu1 %v1305_v14 }
 0x46f   :  { %1096 = vmatprep.subr.mxu1 %v1196_v0 }
 0x470   :  { %1097 = vmatpush3.msra.mxu1 %v1311_v15 }
 0x471   :  { %1098 = vmatprep.subr.mxu1 %v1196_v0 }
 0x472   :  { %1099 = vmatpush3.msra.mxu1 %v1317_v16 }
 0x513   :  { %v508_v43 = vpop.f32.mrf.mxu1 }
 0x514   :  { %v512_v44 = vadd.f32 %v508_v43, %v441_v42 }
 0x515   :  { %v1032_v45 = vpop.f32.mrf.mxu1 }
 0x516   :  { %1120 = vtanh.f32 %v512_v44 }
 0x523   :  { %v1121_v46 = vpop.eup %1120 }
 0x524   :  { %515 = vst [vmem:[#allocation8 + $0x28] sm:$0xff] %v1121_v46  ;;  %1066 = vmatmul.mubr.f32.vlgmr.msra.gmra.mxu0 %v1121_v46 }
 0x5e4   :  { %v584_v48 = vpop.f32.mrf.mxu0 }
 0x5e5   :  { %v588_v49 = vadd.f32 %v584_v48, %v517_v47 }
 0x5e6   :  { %v1067_v50 = vpop.f32.mrf.mxu0 }
 0x5e7   :  { %1122 = vtanh.f32 %v588_v49 }
 0x5f4   :  { %v1123_v51 = vpop.eup %1122 }
 0x5f5   :  { %591 = vst [vmem:[#allocation8 + $0x30] sm:$0xff] %v1123_v51  ;;  %1101 = vmatmul.mubr.f32.vlgmr.msra.gmra.mxu1 %v1123_v51 }
 0x6b5   :  { %v660_v53 = vpop.f32.mrf.mxu1 }
 0x6b6   :  { %v664_v54 = vadd.f32 %v660_v53, %v593_v52 }
 0x6b7   :  { %v1102_v55 = vpop.f32.mrf.mxu1 }
 0x6b8   :  { %1124 = vtanh.f32 %v664_v54 }
 0x6c5   :  { %v1125_v56 = vpop.eup %1124 }
 0x6c6   :  { %667 = vst [vmem:[#allocation8 + $0x38] sm:$0xff] %v1125_v56 }
 0x6c7   :  { %1177 = shalt.err (!%p1174_p0)
}
 0x6c8   :  { %680 = dma.vmem_to_hbm [thread:$0]  %s675_s1, 1024, %s1539_s2, [#allocation5], %s1193_s12, %s1193_s12, %s1194_s13  }
 0x6c9   :  { %1190 = dma.done.wait [#allocation5], 1024  }
 0x6ca   :  { %1191 = vsyncadd [#allocation5], 4294966272 }
 0x6cb   :  { %684 = vsyncpa [#allocation4], 1 }
 0x6cc   :  { %685 = vsyncpa [#allocation7], 1 }
 0x6cd   :  { %686 = vsyncpa [#allocation5], 1 }

</bundles_post_ra>
